<compile_context>
chip_gen: v7x
topology: tpu7x:2x2x1
jax: 0.10.0
libtpu: 0.0.40
codegen_flags: <defaults>
</compile_context>

<pallas_src>
import jax
import jax.numpy as jnp
from jax.experimental import pallas as pl
from jax.experimental.pallas import tpu as pltpu


def cat_conv1x1_kernel(x7_ref, x9_ref, w1_ref, w2_ref, b_ref, o_ref):
    # x7_ref, x9_ref: (C_half, blk_hw)   w1_ref, w2_ref: (Cout, C_half)
    # b_ref: (Cout, 1)                   o_ref: (Cout, blk_hw)
    acc = jnp.dot(w1_ref[...], x7_ref[...], preferred_element_type=jnp.float32)
    acc = acc + jnp.dot(w2_ref[...], x9_ref[...], preferred_element_type=jnp.float32)
    o_ref[...] = (acc + b_ref[...]).astype(o_ref.dtype)


def _choose_blk_hw(HW, N, t_hw):
    """Pick a 128-aligned (or full-extent) spatial block size."""
    t = max(128, (t_hw // 128) * 128)
    if HW <= t:
        # Whole extent fits in one block.  If the batch axis gives no
        # parallelism (N == 1), split the spatial axis into >= 2 blocks so
        # both v7x TensorCores receive work.
        if N == 1 and HW >= 256:
            half = -(-HW // 2)              # cdiv(HW, 2)
            return -(-half // 128) * 128    # round up to 128 lanes
        return HW                            # full-dim block (no (8,128) rule)
    return t


def cat_conv1x1(x7, x9, weight, bias, *, t_hw=16384):
    """x7, x9: NCHW [N, 64, H, W]; weight: [16, 128, 1, 1]; bias: [16].
    Returns NCHW [N, 16, H, W], matching torch.cat([x7, x9], 1) -> Conv2d(128, 16, 1)."""
    N, C_half, H, W = x7.shape
    Cout, Cin, _, _ = weight.shape
    assert Cin == 2 * C_half
    HW = H * W
    dsize = jnp.dtype(x7.dtype).itemsize

    # NCHW -> (N, C, H*W): pure reshape, no transpose, no extra HBM traffic.
    # TODO(synk): if the surrounding model tolerates bf16 activations/weights,
    # feed them in bf16 to halve HBM traffic (accumulation stays f32).
    x7_r = x7.reshape(N, C_half, HW)
    x9_r = x9.reshape(N, C_half, HW)

    w2d = weight.reshape(Cout, Cin)
    w1 = w2d[:, :C_half]            # (16, 64) applied to x7 half (cat order)
    w2 = w2d[:, C_half:]            # (16, 64) applied to x9 half
    b = bias.reshape(Cout, 1)

    blk_hw = _choose_blk_hw(HW, N, t_hw)
    grid = (N, pl.cdiv(HW, blk_hw))   # last spatial block may be partial: Pallas
                                      # bounds the DMAs, no pad / slice needed.

    # Explicit scoped-VMEM budget: 2 inputs x 2 buffers + double-buffered
    # output + weights/bias, with modest headroom.  ~18 MiB at blk_hw=16384,
    # safely inside v7x's 64 MiB per-core VMEM and v5e/v6e's 128 MiB.
    vmem_bytes = int(
        4 * C_half * blk_hw * dsize        # two inputs, double-buffered
        + 2 * Cout * blk_hw * dsize        # output, double-buffered
        + 4 * Cout * C_half * dsize        # weights
        + 2 * Cout * dsize                 # bias
        + (4 << 20)                        # headroom
    )

    cost = pl.CostEstimate(
        flops=2 * N * Cout * Cin * HW,
        transcendentals=0,
        bytes_accessed=(N * 2 * C_half * HW * dsize      # activations in
                        + Cout * Cin * dsize + Cout * dsize
                        + N * Cout * HW * dsize),        # output
    )

    out = pl.pallas_call(
        cat_conv1x1_kernel,
        out_shape=jax.ShapeDtypeStruct((N, Cout, HW), x7.dtype),
        grid_spec=pltpu.PrefetchScalarGridSpec(
            num_scalar_prefetch=0,
            grid=grid,
            in_specs=[
                pl.BlockSpec((None, C_half, blk_hw), lambda n, j: (n, 0, j)),
                pl.BlockSpec((None, C_half, blk_hw), lambda n, j: (n, 0, j)),
                pl.BlockSpec((Cout, C_half), lambda n, j: (0, 0)),
                pl.BlockSpec((Cout, C_half), lambda n, j: (0, 0)),
                pl.BlockSpec((Cout, 1), lambda n, j: (0, 0)),
            ],
            out_specs=pl.BlockSpec((None, Cout, blk_hw), lambda n, j: (n, 0, j)),
        ),
        compiler_params=pltpu.CompilerParams(
            dimension_semantics=("parallel", "parallel"),
            vmem_limit_bytes=vmem_bytes,
        ),
        cost_estimate=cost,
    )(x7_r, x9_r, w1, w2, b)

    return out.reshape(N, Cout, H, W)


if __name__ == "__main__":
    key = jax.random.PRNGKey(0)
    k1, k2, k3, k4 = jax.random.split(key, 4)

    # Shapes from the module: x7, x9 = [1, 64, 54, 54]; Conv2d(128, 16, 1).
    N, C_half, H, W = 1, 64, 54, 54
    Cout = 16

    x7 = jax.random.normal(k1, (N, C_half, H, W), dtype=jnp.float32)
    x9 = jax.random.normal(k2, (N, C_half, H, W), dtype=jnp.float32)

    fan_in = 2 * C_half
    bound = 1.0 / (fan_in ** 0.5)
    weight = jax.random.uniform(k3, (Cout, 2 * C_half, 1, 1),
                                minval=-bound, maxval=bound, dtype=jnp.float32)
    bias = jax.random.uniform(k4, (Cout,), minval=-bound, maxval=bound,
                              dtype=jnp.float32)

    out = cat_conv1x1(x7, x9, weight, bias)
    out = jax.block_until_ready(out)

    # Pure-JAX reference (cat + 1x1 conv as einsum).
    x_cat = jnp.concatenate([x7, x9], axis=1)
    ref = jnp.einsum("nchw,oc->nohw", x_cat, weight.reshape(Cout, 2 * C_half)) \
          + bias.reshape(1, Cout, 1, 1)
    assert out.shape == (N, Cout, H, W)
    assert jnp.allclose(out, ref, atol=1e-4, rtol=1e-4)

    print("KERNEL_OK")
</pallas_src>

<mosaic_0001>
module attributes {stable_mosaic.version = 11 : i64} {
  func.func @cat_conv1x1_kernel(%arg0: i32, %arg1: i32, %arg2: memref<1x64x1536xf32, #tpu.memory_space<vmem>>, %arg3: memref<1x64x1536xf32, #tpu.memory_space<vmem>>, %arg4: memref<16x64xf32, #tpu.memory_space<vmem>>, %arg5: memref<16x64xf32, #tpu.memory_space<vmem>>, %arg6: memref<16x1xf32, #tpu.memory_space<vmem>>, %arg7: memref<1x16x1536xf32, #tpu.memory_space<vmem>>) attributes {dimension_semantics = [#tpu.dimension_semantics<parallel>, #tpu.dimension_semantics<parallel>], iteration_bounds = array<i64: 1, 2>, scalar_prefetch = 0 : i64, scratch_operands = 0 : i64, tpu.core_type = #tpu.core_type<tc>, window_params = [{transform_indices = @transform_0, window_bounds = array<i64: 1, 64, 1536>}, {transform_indices = @transform_1, window_bounds = array<i64: 1, 64, 1536>}, {pipeline_mode = #tpu.pipeline_mode<synchronous>, transform_indices = @transform_2, window_bounds = array<i64: 16, 64>}, {pipeline_mode = #tpu.pipeline_mode<synchronous>, transform_indices = @transform_3, window_bounds = array<i64: 16, 64>}, {pipeline_mode = #tpu.pipeline_mode<synchronous>, transform_indices = @transform_4, window_bounds = array<i64: 16, 1>}, {transform_indices = @transform_5, window_bounds = array<i64: 1, 16, 1536>}]} {
    %c0 = arith.constant 0 : index
    %c0_0 = arith.constant 0 : index
    %0 = vector.load %arg4[%c0, %c0_0] : memref<16x64xf32, #tpu.memory_space<vmem>>, vector<16x64xf32>
    %c0_1 = arith.constant 0 : index
    %c0_2 = arith.constant 0 : index
    %c0_3 = arith.constant 0 : index
    %1 = vector.load %arg2[%c0_1, %c0_2, %c0_3] : memref<1x64x1536xf32, #tpu.memory_space<vmem>>, vector<1x64x1536xf32>
    %2 = vector.shape_cast %1 : vector<1x64x1536xf32> to vector<64x1536xf32>
    %cst = arith.constant dense<0.000000e+00> : vector<16x1536xf32>
    %3 = tpu.matmul %0, %2, %cst {dimension_numbers = #tpu.dot_dimension_numbers<[1], [0], [0], [1], [0, 0, 1, 1], [], []>} : vector<16x64xf32>, vector<64x1536xf32>, vector<16x1536xf32> -> vector<16x1536xf32>
    %c0_4 = arith.constant 0 : index
    %c0_5 = arith.constant 0 : index
    %4 = vector.load %arg5[%c0_4, %c0_5] : memref<16x64xf32, #tpu.memory_space<vmem>>, vector<16x64xf32>
    %c0_6 = arith.constant 0 : index
    %c0_7 = arith.constant 0 : index
    %c0_8 = arith.constant 0 : index
    %5 = vector.load %arg3[%c0_6, %c0_7, %c0_8] : memref<1x64x1536xf32, #tpu.memory_space<vmem>>, vector<1x64x1536xf32>
    %6 = vector.shape_cast %5 : vector<1x64x1536xf32> to vector<64x1536xf32>
    %cst_9 = arith.constant dense<0.000000e+00> : vector<16x1536xf32>
    %7 = tpu.matmul %4, %6, %cst_9 {dimension_numbers = #tpu.dot_dimension_numbers<[1], [0], [0], [1], [0, 0, 1, 1], [], []>} : vector<16x64xf32>, vector<64x1536xf32>, vector<16x1536xf32> -> vector<16x1536xf32>
    %8 = arith.addf %3, %7 : vector<16x1536xf32>
    %c0_10 = arith.constant 0 : index
    %c0_11 = arith.constant 0 : index
    %9 = vector.load %arg6[%c0_10, %c0_11] : memref<16x1xf32, #tpu.memory_space<vmem>>, vector<16x1xf32>
    %10 = vector.broadcast %9 : vector<16x1xf32> to vector<16x1536xf32>
    %11 = arith.addf %8, %10 : vector<16x1536xf32>
    %c0_12 = arith.constant 0 : index
    %c0_13 = arith.constant 0 : index
    %c0_14 = arith.constant 0 : index
    %12 = vector.load %arg7[%c0_12, %c0_13, %c0_14] : memref<1x16x1536xf32, #tpu.memory_space<vmem>>, vector<1x16x1536xf32>
    %13 = vector.shape_cast %12 : vector<1x16x1536xf32> to vector<16x1536xf32>
    %14 = vector.shape_cast %11 : vector<16x1536xf32> to vector<1x16x1536xf32>
    tpu.vector_store %arg7[%c0_12, %c0_13, %c0_14], %14 {strides = array<i32>} : memref<1x16x1536xf32, #tpu.memory_space<vmem>>, vector<1x16x1536xf32>,
    return
  }
  func.func @transform_0(%arg0: i32, %arg1: i32) -> (i32, i32, i32) {
    %c0_i32 = arith.constant 0 : i32
    %c0_i32_0 = arith.constant 0 : i32
    return %arg0, %c0_i32, %arg1 : i32, i32, i32
  }
  func.func @transform_1(%arg0: i32, %arg1: i32) -> (i32, i32, i32) {
    %c0_i32 = arith.constant 0 : i32
    %c0_i32_0 = arith.constant 0 : i32
    return %arg0, %c0_i32, %arg1 : i32, i32, i32
  }
  func.func @transform_2(%arg0: i32, %arg1: i32) -> (i32, i32) {
    %c0_i32 = arith.constant 0 : i32
    %c0_i32_0 = arith.constant 0 : i32
    %c0_i32_1 = arith.constant 0 : i32
    return %c0_i32, %c0_i32_0 : i32, i32
  }
  func.func @transform_3(%arg0: i32, %arg1: i32) -> (i32, i32) {
    %c0_i32 = arith.constant 0 : i32
    %c0_i32_0 = arith.constant 0 : i32
    %c0_i32_1 = arith.constant 0 : i32
    return %c0_i32, %c0_i32_0 : i32, i32
  }
  func.func @transform_4(%arg0: i32, %arg1: i32) -> (i32, i32) {
    %c0_i32 = arith.constant 0 : i32
    %c0_i32_0 = arith.constant 0 : i32
    %c0_i32_1 = arith.constant 0 : i32
    return %c0_i32, %c0_i32_0 : i32, i32
  }
  func.func @transform_5(%arg0: i32, %arg1: i32) -> (i32, i32, i32) {
    %c0_i32 = arith.constant 0 : i32
    %c0_i32_0 = arith.constant 0 : i32
    return %arg0, %c0_i32, %arg1 : i32, i32, i32
  }
}

</mosaic_0001>

<bundles_post_ra>
// kernel: tpu_custom_call.1
= control target key start
LH: loop header
LB: loop body
LE: loop exit
PB: predicated region body
PF: predicated region fallthrough
CT: control target
= control target key end

     0   :  { %s2889_s0 = inlined_call_operand.hbm [shape: f32[1,64,2916], index: 0, kind: input, shape index: {}]   ;;  %s2890_s1 = inlined_call_operand.hbm [shape: f32[1,64,2916], index: 1, kind: input, shape index: {}]   ;;  %s2891_s2 = inlined_call_operand.vmem [shape: f32[16,64], index: 2, kind: input, shape index: {}]   ;;  %s2892_s3 = inlined_call_operand.hbm [shape: f32[16,64], index: 3, kind: input, shape index: {}]   ;;  %s2893_s4 = inlined_call_operand.vmem [shape: f32[16,1], index: 4, kind: input, shape index: {}]   ;;  %s2894_s5 = inlined_call_operand.hbm [shape: f32[1,16,2916], index: 5, kind: output, shape index: {}]  }
   0x1   :  { %2899 = sst [smem:[#allocation15_spill]] %s2892_s3 }
   0x2   :  { %10 = vsyncpa [#allocation3], 0 }
   0x3   :  { %12 = vsyncpa [#allocation3 + $0x1], 0 }
   0x4   :  { %13 = vsyncpa [#allocation6], 0 }
   0x5   :  { %15 = vsyncpa [#allocation6 + $0x1], 0 }
   0x6   :  { %16 = vsyncpa [#allocation4], 0 }
   0x7   :  { %18 = vsyncpa [#allocation4 + $0x1], 0  ;;  %s2264_s18 = smov 0   ;;  %s2266_s19 = smov 0  }
   0x8   :  { %s2268_s20 = smov 0   ;;  %s2270_s21 = smov 0  }
   0x9   :  { %s2272_s22 = smov 0   ;;  %s2274_s23 = smov 0  }
   0xa LB: > { %s2295_s24 = sadd.s32 4294967295, %s2218_s23   ;;  %s1687_s25 = sadd.s32 4294967294, %s2218_s23   ;;  %s2218_s23 = sphi %s2274_s23, %s24_s23   ;;  %s2214_s22 = sphi %s2272_s22, %s2924_s22   ;;  %s2210_s21 = sphi %s2270_s21, %s2923_s21   ;;  %s2206_s20 = sphi %s2268_s20, %s2922_s20   ;;  %s2202_s19 = sphi %s2266_s19, %s2921_s19   ;;  %s2198_s18 = sphi %s2264_s18, %s2920_s18  }
   0xb   : > { %s33_s26 = sadd.s32 1, %s2214_s22  ;;  %s45_s27 = sadd.s32 1, %s2206_s20 }
   0xc   : > { %p34_p0 = scmp.ge.s32.totalorder %s33_s26, 2  ;;  %p52_p1 = scmp.ne.s32.totalorder %s2206_s20, %s2202_s19 }
   0xd   : > { %p53_p2 = scmp.eq.s32.totalorder %s2218_s23, 0  ;;  %p58_p3 = scmp.ne.s32.totalorder %s2202_s19, %s2198_s18 }
   0xe   : > { %s2926_s26 = smov (%p34_p0, %s33_s26), 0  ;;  %p2895_p5 = scmp.eq.s32.totalorder %s2295_s24, 0 }
   0xf   : > { %2900 = sst [smem:[#allocation13_spill]] %s2926_s26  ;;  %p2307_p4 = por %p53_p2, %p52_p1 }
  0x10   : > { %s41_s29 = ssub.s32 %s2214_s22, %s2926_s26  ;;  %p175_p6 = scmp.eq.s32.totalorder %s2295_s24, 1 }
  0x11   : > { %s2901_s28 = scalar_select %p2307_p4, 1, 0 }
  0x12   : > { %p43_p7 = scmp.eq.s32.totalorder %s41_s29, 0  ;;  %p2317_p8 = por %p2895_p5, %p58_p3 }
  0x13   : > { %p2321_p9 = por %p175_p6, %p52_p1  ;;  %p181_p10 = scmp.eq.s32.totalorder %s1687_s25, 1 }
  0x14   : > { %s2902_s30 = scalar_select %p2317_p8, 1, 0 }
  0x15   : > { %s2903_s6 = scalar_select %p2321_p9, 1, 0 }
  0x16   : > { %s2326_s7 = scalar_select %p43_p7, %s2206_s20, %s45_s27  }
  0x17   : > { %p2328_p11 = por %p181_p10, %p58_p3  ;;  %p1688_p12 = scmp.ge.s32.totalorder %s2218_s23, 1 }
  0x18   : > { %2904 = sst [smem:[#allocation14_spill]] %s2326_s7  ;;  %p188_p13 = scmp.lt.s32.totalorder %s2218_s23, 3 }
  0x19   : > { %s2905_s8 = scalar_select %p2328_p11, 1, 0 }
  0x1a   : > { %p2334_p0 = pnand %p1688_p12, %p188_p13  ;;  %s2220_s10 = smov [#allocation7]  }
  0x1b   : > { %s203_s11 = sshll.u32 %s2220_s10, 4  ;;  %s2908_s3 = sld [smem:[#allocation15_spill]]  ;;  %s204_s11 = int_to_ptr.vmem [resolvable:$true] %s203_s11 }
  0x1c   : > { %s2906_s9 = scalar_select %p2334_p0, 1, 0 }
  0x1d   : > { %p1973_p1 = pneg %p2334_p0 }
  0x1f   : > { %p2342_p2 = pnand %p1973_p1, %p2895_p5 }
  0x21   : > { %s2044_s15 = scalar_lea.hbm %s2908_s3, 256  ;;  %p2046_p6 = pneg %p2342_p2 }
  0x22   : > { %p2045_p3 = scmp.ne.s32.totalorder %s2908_s3, %s2044_s15  ;;  %p2051_p12 = scmp.lt.u32.totalorder %s2044_s15, %s2908_s3 }
  0x24   : > { %p2047_p7 = pnand %p2046_p6, %p2045_p3 }
  0x26   : > { %p2048_p10 = pneg %p2047_p7 }
  0x28   : > { %p2053_p13 = pnand %p2051_p12, %p2048_p10 }
  0x2a   : > { %2056 = shalt.err (!%p2053_p13)
}
  0x2b   : > { %s2057_s29 = scalar_lea.vmem %s204_s11, 256  ;;  %p2065_p9 = scmp.lt.s32.totalorder %s204_s11, %s204_s11 }
  0x2c   : > { %p2058_p1 = scmp.ne.s32.totalorder %s204_s11, %s2057_s29  ;;  %p2066_p8 = scmp.lt.s32.totalorder %s2057_s29, %s2057_s29 }
  0x2e   : > { %p2060_p5 = pnand %p2058_p1, %p2046_p6  ;;  %p2067_p0 = por %p2066_p8, %p2065_p9 }
  0x30   : > { %p2061_p11 = pneg %p2060_p5 }
  0x32   : > { %p2068_p4 = pnand %p2067_p0, %p2061_p11 }
  0x34   : > { %2071 = shalt.err (!%p2068_p4)
}
  0x35   : > { %s2221_s10 = smov 128   ;;  %s2222_s13 = smov 8  }
  0x36   : > { %1976 = dma.hbm_to_vmem [thread:$0]  (!%p2342_p2), %s2908_s3, 256, %s204_s11, [#allocation6], %s2221_s10, %s2221_s10, %s2222_s13  }
  0x37   : > { %p1690_p3 = scmp.ge.s32.totalorder %s2218_s23, 2 }
  0x38   : > { %p2909_p5 = scmp.ne.s32.totalorder (!%p1690_p3), %s2901_s28, 0 }
  0x39   : > { %216 = sbr.rel (%p1690_p3) target bundleno = 137 (0x89), region = 28 }
  0x40   : > { %219 = sbr.rel (!%p2909_p5) target bundleno = 100 (0x64), region = 32  ;;  %s220_s15 = sand.u32 (%p2909_p5), 1, %s2206_s20  }
  0x41   : > { %s225_s17 = smul.u32 (%p2909_p5), 12, %s2214_s22  ;;  %s2375_s29 = scalar_lea.sflag (%p2909_p5), [#allocation3], %s220_s15 }
  0x42   : > { %s1962_s25 = smul.u32 (%p2909_p5), 768, %s220_s15 }
  0x43   : > { %s226_s27 = ssub.s32 (%p2909_p5), 23, %s225_s17 }
  0x44   : > { %p227_p4 = scmp.lt.s32.totalorder (%p2909_p5), %s226_s27, 12  ;;  %s224_s10 = scalar_lea.vmem (%p2909_p5), [#allocation2], %s1962_s25 }
  0x47   : > { %s2928_s27 = smov (!%p227_p4, %s226_s27), 12 }
  0x48   : > { %s2372_s12 = sshll.u32 %s2928_s27, 10 }
  0x49   : > { %s231_s11 = ssub.s32 12288, %s2372_s12 }
  0x4a   : > { %232 = vsyncadd %s2375_s29, %s231_s11  ;;  %p1692_p8 = scmp.ne.s32.totalorder %s2372_s12, 0  ;;  %s1737_s13 = smul.u32 1536, %s2214_s22 }
  0x4b   : > { %s240_s16 = sshll.u32 %s224_s10, 4  ;;  %s2076_s10 = scalar_lea.hbm %s2889_s0, 23552  ;;  %s2386_s16 = int_to_ptr.vmem [resolvable:$true] %s240_s16 }
  0x4c   : > { %s2384_s26 = scalar_lea.hbm %s2889_s0, %s1737_s13 }
  0x4d   : > { %s2072_s15 = scalar_lea.hbm %s2384_s26, %s2372_s12  ;;  %p2077_p2 = scmp.lt.u32.totalorder %s2384_s26, %s2889_s0 }
  0x4e   : > { %p2073_p9 = scmp.ne.s32.totalorder %s2384_s26, %s2072_s15  ;;  %p2078_p6 = scmp.lt.u32.totalorder %s2076_s10, %s2072_s15 }
  0x4f   : > { %p2080_p10 = scmp.lt.u32.totalorder %s2072_s15, %s2384_s26 }
  0x50   : > { %p2074_p11 = pnand %p2073_p9, %p1692_p8  ;;  %p2079_p7 = por %p2078_p6, %p2077_p2 }
  0x52   : > { %p2075_p0 = pneg %p2074_p11  ;;  %p2081_p12 = por %p2080_p10, %p2079_p7 }
  0x54   : > { %p2082_p13 = pnand %p2081_p12, %p2075_p0 }
  0x56   : > { %2085 = shalt.err (!%p2082_p13)
}
  0x57   : > { %s2086_s3 = scalar_lea.vmem %s2386_s16, %s2372_s12  ;;  %s2223_s13 = smov [#allocation2]  }
  0x58   : > { %p2087_p1 = scmp.ne.s32.totalorder %s2386_s16, %s2086_s3  ;;  %s2090_s17 = sshll.u32 %s2223_s13, 4  ;;  %s2091_s17 = int_to_ptr.vmem [resolvable:$false] %s2090_s17 }
  0x59   : > { %s2092_s7 = scalar_lea.vmem %s2091_s17, 24576  ;;  %p2093_p9 = scmp.lt.s32.totalorder %s2386_s16, %s2091_s17 }
  0x5a   : > { %p2088_p5 = pnand %p2087_p1, %p1692_p8  ;;  %p2094_p11 = scmp.lt.s32.totalorder %s2092_s7, %s2086_s3 }
  0x5c   : > { %p2089_p4 = pneg %p2088_p5  ;;  %p2095_p2 = por %p2094_p11, %p2093_p9 }
  0x5e   : > { %p2096_p6 = pnand %p2095_p2, %p2089_p4 }
  0x60   : > { %2099 = shalt.err (!%p2096_p6)
}
  0x61   : > { %s2224_s14 = smov 2944   ;;  %s2225_s15 = smov 1536  }
  0x62   : > { %s2910_s25 = sshll.u32 %s2928_s27, 3 }
  0x63   : > { %246 = dma.hbm_to_vmem [thread:$0]  (%p1692_p8), %s2384_s26, %s2372_s12, %s2386_s16, %s2375_s29, %s2224_s14, %s2225_s15, %s2910_s25  }
  0x64 PF: > { %p2911_p0 = scmp.ne.s32.totalorder %s2901_s28, 0 }
  0x65   : > { %s250_s11 = sand.u32 (%p2911_p0), 1, %s2218_s23   ;;  %s252_s10 = sand.u32 (%p2911_p0), 1, %s2206_s20  }
  0x66   : > { %249 = sbr.rel (!%p2911_p0) target bundleno = 137 (0x89), region = 36  ;;  %s2426_s27 = scalar_lea.sflag (%p2911_p0), [#allocation6], %s250_s11 }
  0x67   : > { %s1963_s3 = smul.u32 (%p2911_p0), 768, %s252_s10 }
  0x68   : > { %s255_s13 = smul.u32 (%p2911_p0), 12, %s2214_s22 }
  0x69   : > { %s254_s28 = scalar_lea.vmem (%p2911_p0), [#allocation5], %s1963_s3 }
  0x6a   : > { %s256_s17 = ssub.s32 (%p2911_p0), 23, %s255_s13 }
  0x6b   : > { %p257_p7 = scmp.lt.s32.totalorder (%p2911_p0), %s256_s17, 12 }
  0x6d   : > { %s2930_s17 = smov (!%p257_p7, %s256_s17), 12 }
  0x6e   : > { %s2423_s7 = sshll.u32 %s2930_s17, 10 }
  0x6f   : > { %s261_s26 = ssub.s32 12288, %s2423_s7 }
  0x70   : > { %262 = vsyncadd %s2426_s27, %s261_s26  ;;  %p1698_p8 = scmp.ne.s32.totalorder %s2423_s7, 0  ;;  %s1740_s12 = smul.u32 1536, %s2214_s22 }
  0x71   : > { %s1700_s29 = sshll.u32 %s2930_s17, 3  ;;  %s270_s16 = sshll.u32 %s254_s28, 4  ;;  %s2437_s16 = int_to_ptr.vmem [resolvable:$true] %s270_s16 }
  0x72   : > { %s2435_s25 = scalar_lea.hbm %s2890_s1, %s1740_s12  ;;  %s2104_s13 = scalar_lea.hbm %s2890_s1, 23552 }
  0x73   : > { %s2100_s11 = scalar_lea.hbm %s2435_s25, %s2423_s7  ;;  %p2105_p1 = scmp.lt.u32.totalorder %s2435_s25, %s2890_s1 }
  0x74   : > { %p2101_p10 = scmp.ne.s32.totalorder %s2435_s25, %s2100_s11  ;;  %p2106_p5 = scmp.lt.u32.totalorder %s2104_s13, %s2100_s11 }
  0x75   : > { %p2108_p9 = scmp.lt.u32.totalorder %s2100_s11, %s2435_s25 }
  0x76   : > { %p2102_p12 = pnand %p2101_p10, %p1698_p8  ;;  %p2107_p4 = por %p2106_p5, %p2105_p1 }
  0x78   : > { %p2103_p13 = pneg %p2102_p12  ;;  %p2109_p11 = por %p2108_p9, %p2107_p4 }
  0x7a   : > { %p2110_p2 = pnand %p2109_p11, %p2103_p13 }
  0x7c   : > { %2113 = shalt.err (!%p2110_p2)
}
  0x7d   : > { %s2114_s12 = scalar_lea.vmem %s2437_s16, %s2423_s7  ;;  %s2226_s14 = smov [#allocation5]  }
  0x7e   : > { %p2115_p6 = scmp.ne.s32.totalorder %s2437_s16, %s2114_s12  ;;  %s2118_s15 = sshll.u32 %s2226_s14, 4  ;;  %s2119_s15 = int_to_ptr.vmem [resolvable:$false] %s2118_s15 }
  0x7f   : > { %s2120_s10 = scalar_lea.vmem %s2119_s15, 24576  ;;  %p2121_p10 = scmp.lt.s32.totalorder %s2437_s16, %s2119_s15 }
  0x80   : > { %p2116_p0 = pnand %p2115_p6, %p1698_p8  ;;  %p2122_p12 = scmp.lt.s32.totalorder %s2120_s10, %s2114_s12 }
  0x82   : > { %p2117_p7 = pneg %p2116_p0  ;;  %p2123_p1 = por %p2122_p12, %p2121_p10 }
  0x84   : > { %p2124_p5 = pnand %p2123_p1, %p2117_p7 }
  0x86   : > { %2127 = shalt.err (!%p2124_p5)
}
  0x87   : > { %s2227_s11 = smov 2944   ;;  %s2228_s3 = smov 1536  }
  0x88   : > { %276 = dma.hbm_to_vmem [thread:$0]  (%p1698_p8), %s2435_s25, %s2423_s7, %s2437_s16, %s2426_s27, %s2227_s11, %s2228_s3, %s1700_s29  }
  0x89 PF: > { %p2912_p13 = scmp.ne.s32.totalorder %s2906_s9, 0 }
  0x8a   : > { %s2469_s13 = sand.u32 (!%p2912_p13), 1, %s2202_s19   ;;  %p2913_p4 = scmp.ne.s32.totalorder (!%p2912_p13), %s2902_s30, 0 }
  0x8b   : > { %282 = sbr.rel (%p2912_p13) target bundleno = 503 (0x1f7), region = 40  ;;  %s285_s28 = scalar_lea.sflag (!%p2912_p13), [#allocation3], %s2469_s13 }
  0x8c   : > { %s1964_s26 = smul.u32 (!%p2912_p13), 768, %s2469_s13 }
  0x8e   : > { %s2473_s12 = scalar_lea.vmem (!%p2912_p13), [#allocation2], %s1964_s26 }
  0x92   : > { %2181 = dma.done.wait (%p2913_p4), %s285_s28, 12288  }
  0x93   : > { %2183 = vsyncadd (%p2913_p4), %s285_s28, 4294955008  ;;  %s293_s17 = sand.u32 1, %s2295_s24   ;;  %s2480_s7 = scalar_lea.vmem [#allocation5], %s1964_s26 }
  0x94   : > { %s294_s9 = scalar_lea.sflag [#allocation6], %s293_s17 }
  0x95   : > { %2185 = dma.done.wait (%p2913_p4), %s294_s9, 12288  }
  0x96   : > { %2187 = vsyncadd (%p2913_p4), %s294_s9, 4294955008  ;;  %p2914_p8 = scmp.eq.s32.totalorder %s2295_s24, 0 }
  0x98   : > { %2189 = dma.done.wait (%p2914_p8), [#allocation6], 256   ;;  %p2915_p9 = pmov %p2914_p8 }
  0x99   : > { %v2229_v0 = vmov 0.0   ;;  %v2230_v1 = vmov 0   ;;  %v449_v2 = vld [vmem:[%s2480_s7 + $0x8] sm:$0xff]  ;;  %v451_v4 = vld [vmem:[%s2480_s7 + $0x18] sm:$0xff]  ;;  %v448_v7 = vld [vmem:[%s2480_s7] sm:$0xff]  ;;  %vm544_vm0 = vcmask 523264  }
  0x9a   : > { %2191 = vsyncadd (%p2915_p9), [#allocation6], 4294967040  ;;  %615 = vmatprep.mubr.f32.mxu0 %v2229_v0  ;;  %692 = vmatprep.mubr.f32.mxu1 %v2229_v0  ;;  %v461_v3 = vld [vmem:[%s2480_s7 + $0x68] sm:$0xff]  ;;  %v463_v6 = vld [vmem:[%s2480_s7 + $0x78] sm:$0xff]  ;;  %s1965_s10 = smul.u32 192, %s2469_s13  ;;  %s1542_s3 = scalar_lea.sflag [#allocation4], %s2469_s13 }
  0x9b   : > { %2043 = vset.pattern.permute.xlu0 %v2230_v1  ;;  %v1746_v5 = vpack.c.bf16 %v461_v3, %v449_v2  ;;  %v460_v8 = vld [vmem:[%s2480_s7 + $0x60] sm:$0xff]  ;;  %v1762_v9 = vpack.c.bf16 %v463_v6, %v451_v4  ;;  %v450_v11 = vld [vmem:[%s2480_s7 + $0x10] sm:$0xff]  ;;  %v473_v13 = vld [vmem:[%s2480_s7 + $0xc8] sm:$0xff]  ;;  %p2916_p11 = scmp.ne.s32.totalorder %s2903_s6, 0 }
  0x9c   : > { %v1748_v10 = vpack.c.bf16 %v460_v8, %v448_v7  ;;  %v462_v12 = vld [vmem:[%s2480_s7 + $0x70] sm:$0xff]  ;;  %v485_v15 = vld [vmem:[%s2480_s7 + $0x128] sm:$0xff]  ;;  %v475_v16 = vld [vmem:[%s2480_s7 + $0xd8] sm:$0xff]  ;;  %s2777_s11 = scalar_lea.vmem [#allocation8], %s1965_s10  ;;  %s1549_s26 = smul.u32 (%p2916_p11), 12, %s2210_s21 }
  0x9d   : > { %1747 = vmatprep.subr.bf16.mxu0 %v1746_v5  ;;  %v1764_v14 = vpack.c.bf16 %v462_v12, %v450_v11  ;;  %v487_v17 = vld [vmem:[%s2480_s7 + $0x138] sm:$0xff]  ;;  %1763 = vmatprep.subr.bf16.mxu1 %v1762_v9  ;;  %v1750_v18 = vpack.c.bf16 %v485_v15, %v473_v13  ;;  %v472_v20 = vld [vmem:[%s2480_s7 + $0xc0] sm:$0xff]  ;;  %v474_v22 = vld [vmem:[%s2480_s7 + $0xd0] sm:$0xff] }
  0x9e   : > { %1749 = vmatpush1.bf16.msra.mxu0 %v1748_v10  ;;  %v1766_v19 = vpack.c.bf16 %v487_v17, %v475_v16  ;;  %v484_v21 = vld [vmem:[%s2480_s7 + $0x120] sm:$0xff]  ;;  %v486_v24 = vld [vmem:[%s2480_s7 + $0x130] sm:$0xff]  ;;  %v497_v25 = vld [vmem:[%s2480_s7 + $0x188] sm:$0xff]  ;;  %s1550_s28 = ssub.s32 (%p2916_p11), 23, %s1549_s26 }
  0x9f   : > { %1765 = vmatpush1.bf16.msra.mxu1 %v1764_v14  ;;  %v1752_v23 = vpack.c.bf16 %v484_v21, %v472_v20  ;;  %v509_v26 = vld [vmem:[%s2480_s7 + $0x1e8] sm:$0xff]  ;;  %1751 = vmatprep.subr.bf16.mxu0 %v1750_v18  ;;  %v1768_v27 = vpack.c.bf16 %v486_v24, %v474_v22  ;;  %v499_v29 = vld [vmem:[%s2480_s7 + $0x198] sm:$0xff]  ;;  %v496_v31 = vld [vmem:[%s2480_s7 + $0x180] sm:$0xff]  ;;  %p1551_p2 = scmp.lt.s32.totalorder (%p2916_p11), %s1550_s28, 12 }
  0xa0   : > { %1767 = vmatprep.subr.bf16.mxu1 %v1766_v19  ;;  %v1754_v28 = vpack.c.bf16 %v509_v26, %v497_v25  ;;  %v511_v30 = vld [vmem:[%s2480_s7 + $0x1f8] sm:$0xff]  ;;  %v508_v33 = vld [vmem:[%s2480_s7 + $0x1e0] sm:$0xff]  ;;  %v498_v34 = vld [vmem:[%s2480_s7 + $0x190] sm:$0xff] }
  0xa1   : > { %v1770_v32 = vpack.c.bf16 %v511_v30, %v499_v29  ;;  %v510_v35 = vld [vmem:[%s2480_s7 + $0x1f0] sm:$0xff]  ;;  %v1756_v36 = vpack.c.bf16 %v508_v33, %v496_v31  ;;  %v521_v37 = vld [vmem:[%s2480_s7 + $0x248] sm:$0xff]  ;;  %v523_v39 = vld [vmem:[%s2480_s7 + $0x258] sm:$0xff] }
  0xa2   : > { %1753 = vmatpush1.bf16.msra.mxu0 %v1752_v23  ;;  %v533_v38 = vld [vmem:[%s2480_s7 + $0x2a8] sm:$0xff]  ;;  %v1772_v40 = vpack.c.bf16 %v510_v35, %v498_v34  ;;  %v535_v42 = vld [vmem:[%s2480_s7 + $0x2b8] sm:$0xff]  ;;  %v520_v43 = vld [vmem:[%s2480_s7 + $0x240] sm:$0xff] }
  0xa3   : > { %1769 = vmatpush1.bf16.msra.mxu1 %v1768_v27  ;;  %1755 = vmatprep.subr.bf16.mxu0 %v1754_v28  ;;  %v1758_v41 = vpack.c.bf16 %v533_v38, %v521_v37  ;;  %v532_v44 = vld [vmem:[%s2480_s7 + $0x2a0] sm:$0xff]  ;;  %v1774_v45 = vpack.c.bf16 %v535_v42, %v523_v39  ;;  %v522_v46 = vld [vmem:[%s2480_s7 + $0x250] sm:$0xff]  ;;  %v453_v48 = vld [vmem:[%s2480_s7 + $0x28] sm:$0xff] }
  0xa4   : > { %1771 = vmatprep.subr.bf16.mxu1 %v1770_v32  ;;  %v534_v47 = vld [vmem:[%s2480_s7 + $0x2b0] sm:$0xff]  ;;  %v465_v49 = vld [vmem:[%s2480_s7 + $0x88] sm:$0xff]  ;;  %v455_v50 = vld [vmem:[%s2480_s7 + $0x38] sm:$0xff]  ;;  %v1760_v52 = vpack.c.bf16 %v532_v44, %v520_v43 }
  0xa5   : > { %v467_v51 = vld [vmem:[%s2480_s7 + $0x98] sm:$0xff]  ;;  %v1776_v53 = vpack.c.bf16 %v534_v47, %v522_v46  ;;  %v1778_v54 = vpack.c.bf16 %v465_v49, %v453_v48  ;;  %v452_v55 = vld [vmem:[%s2480_s7 + $0x20] sm:$0xff]  ;;  %v454_v57 = vld [vmem:[%s2480_s7 + $0x30] sm:$0xff] }
  0xa6   : > { %1757 = vmatpush1.bf16.msra.mxu0 %v1756_v36  ;;  %v464_v56 = vld [vmem:[%s2480_s7 + $0x80] sm:$0xff]  ;;  %v1794_v58 = vpack.c.bf16 %v467_v51, %v455_v50  ;;  %v466_v59 = vld [vmem:[%s2480_s7 + $0x90] sm:$0xff]  ;;  %v477_v60 = vld [vmem:[%s2480_s7 + $0xe8] sm:$0xff] }
  0xa7   : > { %1773 = vmatpush1.bf16.msra.mxu1 %v1772_v40  ;;  %1759 = vmatprep.subr.bf16.mxu0 %v1758_v41  ;;  %v489_v61 = vld [vmem:[%s2480_s7 + $0x148] sm:$0xff]  ;;  %v479_v62 = vld [vmem:[%s2480_s7 + $0xf8] sm:$0xff]  ;;  %v2536_v1 = vld [vmem:[#allocation7] sm:$0xff]  ;;  %v1780_v2 = vpack.c.bf16 %v464_v56, %v452_v55  ;;  %v1796_v3 = vpack.c.bf16 %v466_v59, %v454_v57 }
  0xa8   : > { %1775 = vmatprep.subr.bf16.mxu1 %v1774_v45  ;;  %v491_v63 = vld [vmem:[%s2480_s7 + $0x158] sm:$0xff]  ;;  %v1782_v4 = vpack.c.bf16 %v489_v61, %v477_v60  ;;  %v476_v5 = vld [vmem:[%s2480_s7 + $0xe0] sm:$0xff]  ;;  %v478_v7 = vld [vmem:[%s2480_s7 + $0xf0] sm:$0xff] }
  0xa9   : > { %v488_v6 = vld [vmem:[%s2480_s7 + $0x140] sm:$0xff]  ;;  %v1798_v8 = vpack.c.bf16 %v491_v63, %v479_v62  ;;  %v490_v9 = vld [vmem:[%s2480_s7 + $0x150] sm:$0xff]  ;;  %v501_v10 = vld [vmem:[%s2480_s7 + $0x1a8] sm:$0xff] }
  0xaa   : > { %1761 = vmatpush1.bf16.msra.mxu0 %v1760_v52  ;;  %v513_v11 = vld [vmem:[%s2480_s7 + $0x208] sm:$0xff]  ;;  %v503_v12 = vld [vmem:[%s2480_s7 + $0x1b8] sm:$0xff]  ;;  %v1784_v14 = vpack.c.bf16 %v488_v6, %v476_v5  ;;  %v1800_v16 = vpack.c.bf16 %v490_v9, %v478_v7  ;;  %v500_v18 = vld [vmem:[%s2480_s7 + $0x1a0] sm:$0xff] }
  0xab   : > { %1777 = vmatpush1.bf16.msra.mxu1 %v1776_v53  ;;  %1779 = vmatprep.subr.bf16.mxu0 %v1778_v54  ;;  %v515_v13 = vld [vmem:[%s2480_s7 + $0x218] sm:$0xff]  ;;  %v2550_v15 = vld [vmem:[#allocation7 + $0x8] sm:$0xff]  ;;  %v1786_v17 = vpack.c.bf16 %v513_v11, %v501_v10  ;;  %v512_v19 = vld [vmem:[%s2480_s7 + $0x200] sm:$0xff] }
  0xac   : > { %1795 = vmatprep.subr.bf16.mxu1 %v1794_v58  ;;  %v502_v20 = vld [vmem:[%s2480_s7 + $0x1b0] sm:$0xff]  ;;  %v1802_v21 = vpack.c.bf16 %v515_v13, %v503_v12  ;;  %v525_v23 = vld [vmem:[%s2480_s7 + $0x268] sm:$0xff]  ;;  %v527_v25 = vld [vmem:[%s2480_s7 + $0x278] sm:$0xff]  ;;  %v1788_v27 = vpack.c.bf16 %v512_v19, %v500_v18 }
  0xad   : > { %1705 = vmatmul.mubr.msk.f32.vlgmr.msra.gmra.mrb[0].mxu0 %vm544_vm0, %v2536_v1  ;;  %v514_v22 = vld [vmem:[%s2480_s7 + $0x210] sm:$0xff]  ;;  %v537_v24 = vld [vmem:[%s2480_s7 + $0x2c8] sm:$0xff]  ;;  %v539_v26 = vld [vmem:[%s2480_s7 + $0x2d8] sm:$0xff] }
  0xae   : > { %1707 = vmatmul.mubr.msk.f32.vlgmr.msra.gmra.mrb[0].mxu1 %vm544_vm0, %v2536_v1  ;;  %1781 = vmatpush1.bf16.msra.mxu0 %v1780_v2  ;;  %v1804_v28 = vpack.c.bf16 %v514_v22, %v502_v20  ;;  %v1790_v29 = vpack.c.bf16 %v537_v24, %v525_v23  ;;  %v524_v30 = vld [vmem:[%s2480_s7 + $0x260] sm:$0xff]  ;;  %v526_v32 = vld [vmem:[%s2480_s7 + $0x270] sm:$0xff]  ;;  %v1806_v33 = vpack.c.bf16 %v539_v26, %v527_v25  ;;  %v457_v35 = vld [vmem:[%s2480_s7 + $0x48] sm:$0xff] }
  0xaf   : > { %1797 = vmatpush1.bf16.msra.mxu1 %v1796_v3  ;;  %1783 = vmatprep.subr.bf16.mxu0 %v1782_v4  ;;  %v536_v31 = vld [vmem:[%s2480_s7 + $0x2c0] sm:$0xff]  ;;  %v538_v34 = vld [vmem:[%s2480_s7 + $0x2d0] sm:$0xff]  ;;  %v469_v36 = vld [vmem:[%s2480_s7 + $0xa8] sm:$0xff] }
  0xb0   : > { %1799 = vmatprep.subr.bf16.mxu1 %v1798_v8  ;;  %621 = vmatprep.mubr.f32.mxu0 %v2229_v0  ;;  %v459_v37 = vld [vmem:[%s2480_s7 + $0x58] sm:$0xff]  ;;  %v1792_v39 = vpack.c.bf16 %v536_v31, %v524_v30  ;;  %v1808_v40 = vpack.c.bf16 %v538_v34, %v526_v32  ;;  %v1810_v41 = vpack.c.bf16 %v469_v36, %v457_v35  ;;  %v456_v42 = vld [vmem:[%s2480_s7 + $0x40] sm:$0xff]  ;;  %v458_v44 = vld [vmem:[%s2480_s7 + $0x50] sm:$0xff] }
  0xb1   : > { %698 = vmatprep.mubr.f32.mxu1 %v2229_v0  ;;  %1706 = vmatmul.mubr.msk.f32.gmra.mrb[2].mxu0 %vm544_vm0, %v2550_v15  ;;  %v471_v38 = vld [vmem:[%s2480_s7 + $0xb8] sm:$0xff]  ;;  %v468_v43 = vld [vmem:[%s2480_s7 + $0xa0] sm:$0xff]  ;;  %v470_v46 = vld [vmem:[%s2480_s7 + $0xb0] sm:$0xff] }
  0xb2   : > { %1785 = vmatpush1.bf16.msra.mxu0 %v1784_v14  ;;  %1708 = vmatmul.mubr.msk.f32.gmra.mrb[2].mxu1 %vm544_vm0, %v2550_v15  ;;  %v1826_v45 = vpack.c.bf16 %v471_v38, %v459_v37  ;;  %v481_v47 = vld [vmem:[%s2480_s7 + $0x108] sm:$0xff]  ;;  %v483_v49 = vld [vmem:[%s2480_s7 + $0x118] sm:$0xff]  ;;  %v1812_v51 = vpack.c.bf16 %v468_v43, %v456_v42  ;;  %v1828_v52 = vpack.c.bf16 %v470_v46, %v458_v44  ;;  %v480_v54 = vld [vmem:[%s2480_s7 + $0x100] sm:$0xff] }
  0xb3   : > { %1801 = vmatpush1.bf16.msra.mxu1 %v1800_v16  ;;  %1787 = vmatprep.subr.bf16.mxu0 %v1786_v17  ;;  %v493_v48 = vld [vmem:[%s2480_s7 + $0x168] sm:$0xff]  ;;  %v495_v50 = vld [vmem:[%s2480_s7 + $0x178] sm:$0xff]  ;;  %v492_v55 = vld [vmem:[%s2480_s7 + $0x160] sm:$0xff] }
  0xb4   : > { %1803 = vmatprep.subr.bf16.mxu1 %v1802_v21  ;;  %769 = vmatprep.mubr.f32.mxu0 %v2229_v0  ;;  %v1814_v53 = vpack.c.bf16 %v493_v48, %v481_v47  ;;  %v482_v56 = vld [vmem:[%s2480_s7 + $0x110] sm:$0xff]  ;;  %v1830_v57 = vpack.c.bf16 %v495_v50, %v483_v49  ;;  %v505_v59 = vld [vmem:[%s2480_s7 + $0x1c8] sm:$0xff]  ;;  %v507_v61 = vld [vmem:[%s2480_s7 + $0x1d8] sm:$0xff]  ;;  %v1816_v63 = vpack.c.bf16 %v492_v55, %v480_v54 }
  0xb5   : > { %846 = vmatprep.mubr.f32.mxu1 %v2229_v0  ;;  %v494_v58 = vld [vmem:[%s2480_s7 + $0x170] sm:$0xff]  ;;  %v517_v60 = vld [vmem:[%s2480_s7 + $0x228] sm:$0xff]  ;;  %v519_v62 = vld [vmem:[%s2480_s7 + $0x238] sm:$0xff] }
  0xb6   : > { %1789 = vmatpush1.bf16.msra.mxu0 %v1788_v27  ;;  %v1832_v2 = vpack.c.bf16 %v494_v58, %v482_v56  ;;  %v1818_v3 = vpack.c.bf16 %v517_v60, %v505_v59  ;;  %v504_v4 = vld [vmem:[%s2480_s7 + $0x1c0] sm:$0xff]  ;;  %v506_v6 = vld [vmem:[%s2480_s7 + $0x1d0] sm:$0xff]  ;;  %v1834_v7 = vpack.c.bf16 %v519_v62, %v507_v61  ;;  %v529_v9 = vld [vmem:[%s2480_s7 + $0x288] sm:$0xff] }
  0xb7   : > { %1805 = vmatpush1.bf16.msra.mxu1 %v1804_v28  ;;  %1791 = vmatprep.subr.bf16.mxu0 %v1790_v29  ;;  %v516_v5 = vld [vmem:[%s2480_s7 + $0x220] sm:$0xff]  ;;  %v518_v8 = vld [vmem:[%s2480_s7 + $0x230] sm:$0xff]  ;;  %v541_v10 = vld [vmem:[%s2480_s7 + $0x2e8] sm:$0xff] }
  0xb8   : > { %1807 = vmatprep.subr.bf16.mxu1 %v1806_v33  ;;  %v531_v11 = vld [vmem:[%s2480_s7 + $0x298] sm:$0xff]  ;;  %v1820_v13 = vpack.c.bf16 %v516_v5, %v504_v4  ;;  %v1836_v14 = vpack.c.bf16 %v518_v8, %v506_v6  ;;  %v1822_v16 = vpack.c.bf16 %v541_v10, %v529_v9  ;;  %v528_v17 = vld [vmem:[%s2480_s7 + $0x280] sm:$0xff]  ;;  %v530_v19 = vld [vmem:[%s2480_s7 + $0x290] sm:$0xff] }
  0xb9   : > { %v543_v12 = vld [vmem:[%s2480_s7 + $0x2f8] sm:$0xff]  ;;  %v540_v18 = vld [vmem:[%s2480_s7 + $0x2e0] sm:$0xff]  ;;  %v542_v21 = vld [vmem:[%s2480_s7 + $0x2f0] sm:$0xff] }
  0xba   : > { %1793 = vmatpush1.bf16.msra.mxu0 %v1792_v39  ;;  %v1838_v20 = vpack.c.bf16 %v543_v12, %v531_v11  ;;  %v351_v22 = vld [vmem:[%s2473_s12 + $0x8] sm:$0xff]  ;;  %v353_v24 = vld [vmem:[%s2473_s12 + $0x18] sm:$0xff]  ;;  %v1824_v26 = vpack.c.bf16 %v540_v18, %v528_v17  ;;  %v1840_v27 = vpack.c.bf16 %v542_v21, %v530_v19  ;;  %v350_v29 = vld [vmem:[%s2473_s12] sm:$0xff] }
  0xbb   : > { %1809 = vmatpush1.bf16.msra.mxu1 %v1808_v40  ;;  %1811 = vmatprep.subr.bf16.mxu0 %v1810_v41  ;;  %v363_v23 = vld [vmem:[%s2473_s12 + $0x68] sm:$0xff]  ;;  %v365_v25 = vld [vmem:[%s2473_s12 + $0x78] sm:$0xff]  ;;  %v362_v30 = vld [vmem:[%s2473_s12 + $0x60] sm:$0xff] }
  0xbc   : > { %1827 = vmatprep.subr.bf16.mxu1 %v1826_v45  ;;  %v1842_v28 = vpack.c.bf16 %v363_v23, %v351_v22  ;;  %v352_v31 = vld [vmem:[%s2473_s12 + $0x10] sm:$0xff]  ;;  %v1858_v32 = vpack.c.bf16 %v365_v25, %v353_v24  ;;  %v375_v34 = vld [vmem:[%s2473_s12 + $0xc8] sm:$0xff]  ;;  %v377_v36 = vld [vmem:[%s2473_s12 + $0xd8] sm:$0xff]  ;;  %v1844_v38 = vpack.c.bf16 %v362_v30, %v350_v29 }
  0xbd   : > { %1709 = vmatmul.mubr.msk.f32.vlgmr.msra.gmra.mrb[4].mxu0 %vm544_vm0, %v2536_v1  ;;  %v364_v33 = vld [vmem:[%s2473_s12 + $0x70] sm:$0xff]  ;;  %v387_v35 = vld [vmem:[%s2473_s12 + $0x128] sm:$0xff]  ;;  %v389_v37 = vld [vmem:[%s2473_s12 + $0x138] sm:$0xff] }
  0xbe   : > { %1711 = vmatmul.mubr.msk.f32.vlgmr.msra.gmra.mrb[4].mxu1 %vm544_vm0, %v2536_v1  ;;  %1813 = vmatpush1.bf16.msra.mxu0 %v1812_v51  ;;  %v1860_v39 = vpack.c.bf16 %v364_v33, %v352_v31  ;;  %v1846_v40 = vpack.c.bf16 %v387_v35, %v375_v34  ;;  %v374_v41 = vld [vmem:[%s2473_s12 + $0xc0] sm:$0xff]  ;;  %v376_v43 = vld [vmem:[%s2473_s12 + $0xd0] sm:$0xff]  ;;  %v1862_v44 = vpack.c.bf16 %v389_v37, %v377_v36  ;;  %v399_v46 = vld [vmem:[%s2473_s12 + $0x188] sm:$0xff] }
  0xbf   : > { %1829 = vmatpush1.bf16.msra.mxu1 %v1828_v52  ;;  %1815 = vmatprep.subr.bf16.mxu0 %v1814_v53  ;;  %v386_v42 = vld [vmem:[%s2473_s12 + $0x120] sm:$0xff]  ;;  %v388_v45 = vld [vmem:[%s2473_s12 + $0x130] sm:$0xff]  ;;  %v411_v47 = vld [vmem:[%s2473_s12 + $0x1e8] sm:$0xff] }
  0xc0   : > { %1831 = vmatprep.subr.bf16.mxu1 %v1830_v57  ;;  %775 = vmatprep.mubr.f32.mxu0 %v2229_v0  ;;  %v401_v48 = vld [vmem:[%s2473_s12 + $0x198] sm:$0xff]  ;;  %v1848_v50 = vpack.c.bf16 %v386_v42, %v374_v41  ;;  %v1864_v51 = vpack.c.bf16 %v388_v45, %v376_v43  ;;  %v1850_v52 = vpack.c.bf16 %v411_v47, %v399_v46  ;;  %v398_v53 = vld [vmem:[%s2473_s12 + $0x180] sm:$0xff]  ;;  %v400_v55 = vld [vmem:[%s2473_s12 + $0x190] sm:$0xff] }
  0xc1   : > { %852 = vmatprep.mubr.f32.mxu1 %v2229_v0  ;;  %1710 = vmatmul.mubr.msk.f32.gmra.mrb[6].mxu0 %vm544_vm0, %v2550_v15  ;;  %v413_v49 = vld [vmem:[%s2473_s12 + $0x1f8] sm:$0xff]  ;;  %v410_v54 = vld [vmem:[%s2473_s12 + $0x1e0] sm:$0xff]  ;;  %v412_v57 = vld [vmem:[%s2473_s12 + $0x1f0] sm:$0xff] }
  0xc2   : > { %1817 = vmatpush1.bf16.msra.mxu0 %v1816_v63  ;;  %1712 = vmatmul.mubr.msk.f32.gmra.mrb[6].mxu1 %vm544_vm0, %v2550_v15  ;;  %v1866_v56 = vpack.c.bf16 %v413_v49, %v401_v48  ;;  %v435_v58 = vld [vmem:[%s2473_s12 + $0x2a8] sm:$0xff]  ;;  %v425_v59 = vld [vmem:[%s2473_s12 + $0x258] sm:$0xff]  ;;  %v1852_v61 = vpack.c.bf16 %v410_v54, %v398_v53  ;;  %v1868_v62 = vpack.c.bf16 %v412_v57, %v400_v55  ;;  %v424_v4 = vld [vmem:[%s2473_s12 + $0x250] sm:$0xff] }
  0xc3   : > { %1833 = vmatpush1.bf16.msra.mxu1 %v1832_v2  ;;  %1819 = vmatprep.subr.bf16.mxu0 %v1818_v3  ;;  %v437_v60 = vld [vmem:[%s2473_s12 + $0x2b8] sm:$0xff]  ;;  %v422_v2 = vld [vmem:[%s2473_s12 + $0x240] sm:$0xff]  ;;  %v436_v6 = vld [vmem:[%s2473_s12 + $0x2b0] sm:$0xff] }
  0xc4   : > { %1835 = vmatprep.subr.bf16.mxu1 %v1834_v7  ;;  %923 = vmatprep.mubr.f32.mxu0 %v2229_v0  ;;  %v434_v3 = vld [vmem:[%s2473_s12 + $0x2a0] sm:$0xff]  ;;  %v1870_v5 = vpack.c.bf16 %v437_v60, %v425_v59  ;;  %v355_v7 = vld [vmem:[%s2473_s12 + $0x28] sm:$0xff]  ;;  %v369_v9 = vld [vmem:[%s2473_s12 + $0x98] sm:$0xff]  ;;  %v1872_v11 = vpack.c.bf16 %v436_v6, %v424_v4 }
  0xc5   : > { %1000 = vmatprep.mubr.f32.mxu1 %v2229_v0  ;;  %v367_v8 = vld [vmem:[%s2473_s12 + $0x88] sm:$0xff]  ;;  %v1856_v10 = vpack.c.bf16 %v434_v3, %v422_v2  ;;  %v356_v17 = vld [vmem:[%s2473_s12 + $0x30] sm:$0xff]  ;;  %v2671_v19 = vld [vmem:[%s2891_s2] sm:$0xff] }
  0xc6   : > { %1821 = vmatpush1.bf16.msra.mxu0 %v1820_v13  ;;  %v1874_v12 = vpack.c.bf16 %v367_v8, %v355_v7  ;;  %v354_v13 = vld [vmem:[%s2473_s12 + $0x20] sm:$0xff]  ;;  %v368_v18 = vld [vmem:[%s2473_s12 + $0x90] sm:$0xff]  ;;  %v391_v21 = vld [vmem:[%s2473_s12 + $0x148] sm:$0xff] }
  0xc7   : > { %1837 = vmatpush1.bf16.msra.mxu1 %v1836_v14  ;;  %1823 = vmatprep.subr.bf16.mxu0 %v1822_v16  ;;  %v366_v14 = vld [vmem:[%s2473_s12 + $0x80] sm:$0xff]  ;;  %v381_v23 = vld [vmem:[%s2473_s12 + $0xf8] sm:$0xff]  ;;  %v392_v31 = vld [vmem:[%s2473_s12 + $0x150] sm:$0xff] }
  0xc8   : > { %1839 = vmatprep.subr.bf16.mxu1 %v1838_v20  ;;  %v379_v20 = vld [vmem:[%s2473_s12 + $0xe8] sm:$0xff]  ;;  %v1876_v22 = vpack.c.bf16 %v366_v14, %v354_v13  ;;  %v393_v24 = vld [vmem:[%s2473_s12 + $0x158] sm:$0xff]  ;;  %v378_v25 = vld [vmem:[%s2473_s12 + $0xe0] sm:$0xff] }
  0xc9   : > { %v1481_v29 = vld [vmem:[%s2893_s4] sm:$0xff]  ;;  %v1878_v30 = vpack.c.bf16 %v391_v21, %v379_v20  ;;  %v415_v33 = vld [vmem:[%s2473_s12 + $0x208] sm:$0xff]  ;;  %v1894_v34 = vpack.c.bf16 %v393_v24, %v381_v23  ;;  %v405_v35 = vld [vmem:[%s2473_s12 + $0x1b8] sm:$0xff] }
  0xca   : > { %1825 = vmatpush1.bf16.msra.mxu0 %v1824_v26  ;;  %v1892_v26 = vpack.c.bf16 %v368_v18, %v356_v17  ;;  %1485 = vperm.xlu0 %2043, %v1481_v29   ;;  %v417_v36 = vld [vmem:[%s2473_s12 + $0x218] sm:$0xff]  ;;  %v2695_v37 = vld [vmem:[%s2891_s2 + $0x8] sm:$0xff]  ;;  %v402_v41 = vld [vmem:[%s2473_s12 + $0x1a0] sm:$0xff] }
  0xcb   : > { %1841 = vmatpush1.bf16.msra.mxu1 %v1840_v27  ;;  %1843 = vmatprep.subr.bf16.mxu0 %v1842_v28  ;;  %v390_v27 = vld [vmem:[%s2473_s12 + $0x140] sm:$0xff]  ;;  %v380_v28 = vld [vmem:[%s2473_s12 + $0xf0] sm:$0xff]  ;;  %v427_v46 = vld [vmem:[%s2473_s12 + $0x268] sm:$0xff] }
  0xcc   : > { %1859 = vmatprep.subr.bf16.mxu1 %v1858_v32  ;;  %v403_v32 = vld [vmem:[%s2473_s12 + $0x1a8] sm:$0xff]  ;;  %v414_v42 = vld [vmem:[%s2473_s12 + $0x200] sm:$0xff]  ;;  %v404_v43 = vld [vmem:[%s2473_s12 + $0x1b0] sm:$0xff] }
  0xcd   : > { %1713 = vmatmul.mubr.msk.f32.vlgmr.msra.gmra.mrb[8].mxu0 %vm544_vm0, %v2536_v1  ;;  %v416_v45 = vld [vmem:[%s2473_s12 + $0x210] sm:$0xff]  ;;  %v439_v47 = vld [vmem:[%s2473_s12 + $0x2c8] sm:$0xff]  ;;  %v429_v48 = vld [vmem:[%s2473_s12 + $0x278] sm:$0xff] }
  0xce   : > { %1715 = vmatmul.mubr.msk.f32.vlgmr.msra.gmra.mrb[8].mxu1 %vm544_vm0, %v2536_v1  ;;  %1845 = vmatpush1.bf16.msra.mxu0 %v1844_v38  ;;  %v423_v1 = vld [vmem:[%s2473_s12 + $0x248] sm:$0xff]  ;;  %v1880_v38 = vpack.c.bf16 %v390_v27, %v378_v25  ;;  %v441_v49 = vld [vmem:[%s2473_s12 + $0x2d8] sm:$0xff]  ;;  %v1886_v53 = vpack.c.bf16 %v439_v47, %v427_v46  ;;  %v426_v54 = vld [vmem:[%s2473_s12 + $0x260] sm:$0xff] }
  0xcf   : > { %1861 = vmatpush1.bf16.msra.mxu1 %v1860_v39  ;;  %1847 = vmatprep.subr.bf16.mxu0 %v1846_v40  ;;  %v1854_v63 = vpack.c.bf16 %v435_v58, %v423_v1  ;;  %v1896_v39 = vpack.c.bf16 %v392_v31, %v380_v28  ;;  %v1882_v40 = vpack.c.bf16 %v415_v33, %v403_v32  ;;  %v438_v55 = vld [vmem:[%s2473_s12 + $0x2c0] sm:$0xff]  ;;  %v440_v1 = vld [vmem:[%s2473_s12 + $0x2d0] sm:$0xff]  ;;  %v359_v58 = vld [vmem:[%s2473_s12 + $0x48] sm:$0xff] }
  0xd0   : > { %1863 = vmatprep.subr.bf16.mxu1 %v1862_v44  ;;  %929 = vmatprep.mubr.f32.mxu0 %v2229_v0  ;;  %v1898_v44 = vpack.c.bf16 %v417_v36, %v405_v35  ;;  %v1902_v57 = vpack.c.bf16 %v441_v49, %v429_v48  ;;  %v371_v59 = vld [vmem:[%s2473_s12 + $0xa8] sm:$0xff]  ;;  %v361_v60 = vld [vmem:[%s2473_s12 + $0x58] sm:$0xff]  ;;  %v358_v3 = vld [vmem:[%s2473_s12 + $0x40] sm:$0xff] }
  0xd1   : > { %1006 = vmatprep.mubr.f32.mxu1 %v2229_v0  ;;  %1714 = vmatmul.mubr.msk.f32.gmra.mrb[10].mxu0 %vm544_vm0, %v2550_v15  ;;  %v1906_v2 = vpack.c.bf16 %v371_v59, %v359_v58  ;;  %v370_v4 = vld [vmem:[%s2473_s12 + $0xa0] sm:$0xff]  ;;  %v360_v6 = vld [vmem:[%s2473_s12 + $0x50] sm:$0xff]  ;;  %v383_v8 = vld [vmem:[%s2473_s12 + $0x108] sm:$0xff] }
  0xd2   : > { %1849 = vmatpush1.bf16.msra.mxu0 %v1848_v50  ;;  %1716 = vmatmul.mubr.msk.f32.gmra.mrb[10].mxu1 %vm544_vm0, %v2550_v15  ;;  %v357_v15 = vld [vmem:[%s2473_s12 + $0x38] sm:$0xff]  ;;  %v1884_v50 = vpack.c.bf16 %v414_v42, %v402_v41  ;;  %v372_v7 = vld [vmem:[%s2473_s12 + $0xb0] sm:$0xff]  ;;  %v382_v13 = vld [vmem:[%s2473_s12 + $0x100] sm:$0xff] }
  0xd3   : > { %1865 = vmatpush1.bf16.msra.mxu1 %v1864_v51  ;;  %1851 = vmatprep.subr.bf16.mxu0 %v1850_v52  ;;  %v1890_v16 = vpack.c.bf16 %v369_v9, %v357_v15  ;;  %v1482_v51 = vld [vmem:[%s2893_s4 + $0x8] sm:$0xff]  ;;  %v1900_v52 = vpack.c.bf16 %v416_v45, %v404_v43  ;;  %v1908_v9 = vpack.c.bf16 %v370_v4, %v358_v3  ;;  %v394_v14 = vld [vmem:[%s2473_s12 + $0x160] sm:$0xff]  ;;  %v396_v18 = vld [vmem:[%s2473_s12 + $0x170] sm:$0xff] }
  0xd4   : > { %1867 = vmatprep.subr.bf16.mxu1 %v1866_v56  ;;  %1083 = vmatprep.mubr.f32.mxu0 %v2229_v0  ;;  %v428_v56 = vld [vmem:[%s2473_s12 + $0x270] sm:$0xff]  ;;  %v395_v15 = vld [vmem:[%s2473_s12 + $0x168] sm:$0xff]  ;;  %v409_v23 = vld [vmem:[%s2473_s12 + $0x1d8] sm:$0xff]  ;;  %v1912_v25 = vpack.c.bf16 %v394_v14, %v382_v13 }
  0xd5   : > { %1160 = vmatprep.mubr.f32.mxu1 %v2229_v0  ;;  %1490 = vperm.xlu0 %2043, %v1482_v51   ;;  %v1910_v17 = vpack.c.bf16 %v395_v15, %v383_v8  ;;  %v407_v20 = vld [vmem:[%s2473_s12 + $0x1c8] sm:$0xff]  ;;  %v421_v24 = vld [vmem:[%s2473_s12 + $0x238] sm:$0xff]  ;;  %v406_v28 = vld [vmem:[%s2473_s12 + $0x1c0] sm:$0xff] }
  0xd6   : > { %1853 = vmatpush1.bf16.msra.mxu0 %v1852_v61  ;;  %v373_v61 = vld [vmem:[%s2473_s12 + $0xb8] sm:$0xff]  ;;  %v419_v21 = vld [vmem:[%s2473_s12 + $0x228] sm:$0xff]  ;;  %v418_v29 = vld [vmem:[%s2473_s12 + $0x220] sm:$0xff]  ;;  %v1930_v31 = vpack.c.bf16 %v421_v24, %v409_v23 }
  0xd7   : > { %1869 = vmatpush1.bf16.msra.mxu1 %v1868_v62  ;;  %1855 = vmatprep.subr.bf16.mxu0 %v1854_v63  ;;  %v1888_v62 = vpack.c.bf16 %v438_v55, %v426_v54  ;;  %v1904_v63 = vpack.c.bf16 %v440_v1, %v428_v56  ;;  %v1914_v27 = vpack.c.bf16 %v419_v21, %v407_v20  ;;  %v420_v32 = vld [vmem:[%s2473_s12 + $0x230] sm:$0xff]  ;;  %v431_v33 = vld [vmem:[%s2473_s12 + $0x288] sm:$0xff]  ;;  %v433_v35 = vld [vmem:[%s2473_s12 + $0x298] sm:$0xff] }
  0xd8   : > { %1871 = vmatprep.subr.bf16.mxu1 %v1870_v5  ;;  %v1922_v5 = vpack.c.bf16 %v373_v61, %v361_v60  ;;  %v445_v36 = vld [vmem:[%s2473_s12 + $0x2f8] sm:$0xff]  ;;  %v430_v41 = vld [vmem:[%s2473_s12 + $0x280] sm:$0xff]  ;;  %v444_v45 = vld [vmem:[%s2473_s12 + $0x2f0] sm:$0xff] }
  0xd9   : > { %v442_v42 = vld [vmem:[%s2473_s12 + $0x2e0] sm:$0xff]  ;;  %v1934_v43 = vpack.c.bf16 %v445_v36, %v433_v35 }
  0xda   : > { %1857 = vmatpush1.bf16.msra.mxu0 %v1856_v10  ;;  %v385_v10 = vld [vmem:[%s2473_s12 + $0x118] sm:$0xff]  ;;  %v1920_v46 = vpack.c.bf16 %v442_v42, %v430_v41 }
  0xdb   : > { %1873 = vmatpush1.bf16.msra.mxu1 %v1872_v11  ;;  %1875 = vmatprep.subr.bf16.mxu0 %v1874_v12  ;;  %v397_v11 = vld [vmem:[%s2473_s12 + $0x178] sm:$0xff]  ;;  %v1924_v12 = vpack.c.bf16 %v372_v7, %v360_v6 }
  0xdc   : > { %1891 = vmatprep.subr.bf16.mxu1 %v1890_v16  ;;  %v384_v16 = vld [vmem:[%s2473_s12 + $0x110] sm:$0xff] }
  0xdd   : > { %1717 = vmatmul.mubr.msk.f32.vlgmr.msra.gmra.mrb[0].mxu0 %vm544_vm0, %v2671_v19 }
  0xde   : > { %1719 = vmatmul.mubr.msk.f32.vlgmr.msra.gmra.mrb[0].mxu1 %vm544_vm0, %v2671_v19  ;;  %1877 = vmatpush1.bf16.msra.mxu0 %v1876_v22  ;;  %v1926_v22 = vpack.c.bf16 %v397_v11, %v385_v10 }
  0xdf   : > { %1893 = vmatpush1.bf16.msra.mxu1 %v1892_v26  ;;  %1089 = vmatprep.mubr.f32.mxu0 %v2229_v0  ;;  %v1928_v26 = vpack.c.bf16 %v396_v18, %v384_v16 }
  0xe0   : > { %1166 = vmatprep.mubr.f32.mxu1 %v2229_v0  ;;  %1879 = vmatprep.subr.bf16.mxu0 %v1878_v30  ;;  %v408_v30 = vld [vmem:[%s2473_s12 + $0x1d0] sm:$0xff] }
  0xe1   : > { %1718 = vmatmul.mubr.msk.f32.gmra.mrb[2].mxu0 %vm544_vm0, %v2695_v37  ;;  %1895 = vmatprep.subr.bf16.mxu1 %v1894_v34  ;;  %v443_v34 = vld [vmem:[%s2473_s12 + $0x2e8] sm:$0xff] }
  0xe2   : > { %1720 = vmatmul.mubr.msk.f32.gmra.mrb[2].mxu1 %vm544_vm0, %v2695_v37  ;;  %1881 = vmatpush1.bf16.msra.mxu0 %v1880_v38  ;;  %v1916_v38 = vpack.c.bf16 %v418_v29, %v406_v28 }
  0xe3   : > { %1897 = vmatpush1.bf16.msra.mxu1 %v1896_v39  ;;  %1883 = vmatprep.subr.bf16.mxu0 %v1882_v40  ;;  %v1932_v39 = vpack.c.bf16 %v420_v32, %v408_v30  ;;  %v1918_v40 = vpack.c.bf16 %v443_v34, %v431_v33 }
  0xe4   : > { %1899 = vmatprep.subr.bf16.mxu1 %v1898_v44  ;;  %1237 = vmatprep.mubr.f32.mxu0 %v2229_v0  ;;  %v432_v44 = vld [vmem:[%s2473_s12 + $0x290] sm:$0xff] }
  0xe5   : > { %1314 = vmatprep.mubr.f32.mxu1 %v2229_v0  ;;  %v1936_v47 = vpack.c.bf16 %v444_v45, %v432_v44 }
  0xe6   : > { %1885 = vmatpush1.bf16.msra.mxu0 %v1884_v50 }
  0xe7   : > { %1901 = vmatpush1.bf16.msra.mxu1 %v1900_v52  ;;  %1887 = vmatprep.subr.bf16.mxu0 %v1886_v53 }
  0xe8   : > { %1903 = vmatprep.subr.bf16.mxu1 %v1902_v57 }
  0xea   : > { %1889 = vmatpush1.bf16.msra.mxu0 %v1888_v62 }
  0xeb   : > { %1905 = vmatpush1.bf16.msra.mxu1 %v1904_v63  ;;  %1907 = vmatprep.subr.bf16.mxu0 %v1906_v2 }
  0xec   : > { %1923 = vmatprep.subr.bf16.mxu1 %v1922_v5 }
  0xed   : > { %1721 = vmatmul.mubr.msk.f32.vlgmr.msra.gmra.mrb[4].mxu0 %vm544_vm0, %v2671_v19 }
  0xee   : > { %1723 = vmatmul.mubr.msk.f32.vlgmr.msra.gmra.mrb[4].mxu1 %vm544_vm0, %v2671_v19  ;;  %1909 = vmatpush1.bf16.msra.mxu0 %v1908_v9 }
  0xef   : > { %1925 = vmatpush1.bf16.msra.mxu1 %v1924_v12  ;;  %1243 = vmatprep.mubr.f32.mxu0 %v2229_v0 }
  0xf0   : > { %1320 = vmatprep.mubr.f32.mxu1 %v2229_v0  ;;  %1911 = vmatprep.subr.bf16.mxu0 %v1910_v17 }
  0xf1   : > { %1722 = vmatmul.mubr.msk.f32.gmra.mrb[6].mxu0 %vm544_vm0, %v2695_v37  ;;  %1927 = vmatprep.subr.bf16.mxu1 %v1926_v22 }
  0xf2   : > { %1724 = vmatmul.mubr.msk.f32.gmra.mrb[6].mxu1 %vm544_vm0, %v2695_v37  ;;  %1913 = vmatpush1.bf16.msra.mxu0 %v1912_v25 }
  0xf3   : > { %1929 = vmatpush1.bf16.msra.mxu1 %v1928_v26  ;;  %1915 = vmatprep.subr.bf16.mxu0 %v1914_v27 }
  0xf4   : > { %1931 = vmatprep.subr.bf16.mxu1 %v1930_v31  ;;  %1391 = vmatprep.mubr.f32.mxu0 %v2229_v0 }
  0xf5   : > { %1468 = vmatprep.mubr.f32.mxu1 %v2229_v0 }
  0xf6   : > { %1917 = vmatpush1.bf16.msra.mxu0 %v1916_v38 }
  0xf7   : > { %1933 = vmatpush1.bf16.msra.mxu1 %v1932_v39  ;;  %1919 = vmatprep.subr.bf16.mxu0 %v1918_v40 }
  0xf8   : > { %1935 = vmatprep.subr.bf16.mxu1 %v1934_v43 }
  0xfa   : > { %1921 = vmatpush1.bf16.msra.mxu0 %v1920_v46 }
  0xfb   : > { %1937 = vmatpush1.bf16.msra.mxu1 %v1936_v47 }
  0xfd   : > { %1725 = vmatmul.mubr.msk.f32.vlgmr.msra.gmra.mrb[8].mxu0 %vm544_vm0, %v2671_v19 }
  0xfe   : > { %1727 = vmatmul.mubr.msk.f32.vlgmr.msra.gmra.mrb[8].mxu1 %vm544_vm0, %v2671_v19  ;;  %1397 = vmatprep.mubr.f32.mxu0 %v2229_v0 }
  0xff   : > { %1474 = vmatprep.mubr.f32.mxu1 %v2229_v0 }
 0x101   : > { %1726 = vmatmul.mubr.msk.f32.gmra.mrb[10].mxu0 %vm544_vm0, %v2695_v37 }
 0x102   : > { %1728 = vmatmul.mubr.msk.f32.gmra.mrb[10].mxu1 %vm544_vm0, %v2695_v37 }
 0x149   : > { %v1486_v48 = vpop.permute.xlu0 %1485 }
 0x154   : > { %v2775_v19 = vpop.permute.xlu0 %1490 }
 0x1b0   : > { %v1085_v49 = vpop.f32.mrb[0].mxu0 }
 0x1b1   : > { %v1493_v50 = vadd.f32 %v1486_v48, %v1085_v49  ;;  %v1162_v51 = vpop.f32.mrb[0].mxu1  ;;  %v1087_v52 = vpop.f32.mrb[1].mxu0 }
 0x1b2   : > { %v1495_v53 = vadd.f32 %v1486_v48, %v1162_v51  ;;  %v1494_v54 = vadd.f32 %v1486_v48, %v1087_v52  ;;  %v1164_v55 = vpop.f32.mrb[1].mxu1 }
 0x1b3   : > { %1517 = vst [vmem:[%s2777_s11] sm:$0xff] %v1493_v50  ;;  %v1496_v0 = vadd.f32 %v1486_v48, %v1164_v55 }
 0x1b4   : > { %1519 = vst [vmem:[%s2777_s11 + $0x10] sm:$0xff] %v1495_v53  ;;  %1518 = vst [vmem:[%s2777_s11 + $0x8] sm:$0xff] %v1494_v54  ;;  %v1091_v37 = vpop.f32.mrb[2].mxu0 }
 0x1b5   : > { %1520 = vst [vmem:[%s2777_s11 + $0x18] sm:$0xff] %v1496_v0  ;;  %v1505_v56 = vadd.f32 %v2775_v19, %v1091_v37  ;;  %v1168_v57 = vpop.f32.mrb[2].mxu1  ;;  %v1093_v1 = vpop.f32.mrb[3].mxu0 }
 0x1b6   : > { %v1507_v58 = vadd.f32 %v2775_v19, %v1168_v57  ;;  %v1506_v59 = vadd.f32 %v2775_v19, %v1093_v1  ;;  %v1170_v60 = vpop.f32.mrb[3].mxu1 }
 0x1b7   : > { %1529 = vst [vmem:[%s2777_s11 + $0x60] sm:$0xff] %v1505_v56  ;;  %v1508_v61 = vadd.f32 %v2775_v19, %v1170_v60 }
 0x1b8   : > { %1531 = vst [vmem:[%s2777_s11 + $0x70] sm:$0xff] %v1507_v58  ;;  %1530 = vst [vmem:[%s2777_s11 + $0x68] sm:$0xff] %v1506_v59 }
 0x1b9   : > { %1532 = vst [vmem:[%s2777_s11 + $0x78] sm:$0xff] %v1508_v61 }
 0x1c0   : > { %v1239_v62 = vpop.f32.mrb[4].mxu0 }
 0x1c1   : > { %v1497_v63 = vadd.f32 %v1486_v48, %v1239_v62  ;;  %v1316_v2 = vpop.f32.mrb[4].mxu1  ;;  %v1241_v3 = vpop.f32.mrb[5].mxu0 }
 0x1c2   : > { %v1499_v4 = vadd.f32 %v1486_v48, %v1316_v2  ;;  %v1498_v5 = vadd.f32 %v1486_v48, %v1241_v3  ;;  %v1318_v6 = vpop.f32.mrb[5].mxu1 }
 0x1c3   : > { %1521 = vst [vmem:[%s2777_s11 + $0x20] sm:$0xff] %v1497_v63  ;;  %v1500_v7 = vadd.f32 %v1486_v48, %v1318_v6 }
 0x1c4   : > { %1523 = vst [vmem:[%s2777_s11 + $0x30] sm:$0xff] %v1499_v4  ;;  %1522 = vst [vmem:[%s2777_s11 + $0x28] sm:$0xff] %v1498_v5  ;;  %v1245_v8 = vpop.f32.mrb[6].mxu0 }
 0x1c5   : > { %1524 = vst [vmem:[%s2777_s11 + $0x38] sm:$0xff] %v1500_v7  ;;  %v1509_v15 = vadd.f32 %v2775_v19, %v1245_v8  ;;  %v1322_v9 = vpop.f32.mrb[6].mxu1  ;;  %v1247_v10 = vpop.f32.mrb[7].mxu0 }
 0x1c6   : > { %v1511_v11 = vadd.f32 %v2775_v19, %v1322_v9  ;;  %v1510_v12 = vadd.f32 %v2775_v19, %v1247_v10  ;;  %v1324_v13 = vpop.f32.mrb[7].mxu1 }
 0x1c7   : > { %1533 = vst [vmem:[%s2777_s11 + $0x80] sm:$0xff] %v1509_v15  ;;  %v1512_v14 = vadd.f32 %v2775_v19, %v1324_v13 }
 0x1c8   : > { %1535 = vst [vmem:[%s2777_s11 + $0x90] sm:$0xff] %v1511_v11  ;;  %1534 = vst [vmem:[%s2777_s11 + $0x88] sm:$0xff] %v1510_v12 }
 0x1c9   : > { %1536 = vst [vmem:[%s2777_s11 + $0x98] sm:$0xff] %v1512_v14 }
 0x1d0   : > { %v1393_v16 = vpop.f32.mrb[8].mxu0 }
 0x1d1   : > { %v1501_v17 = vadd.f32 %v1486_v48, %v1393_v16  ;;  %v1470_v18 = vpop.f32.mrb[8].mxu1  ;;  %v1395_v20 = vpop.f32.mrb[9].mxu0 }
 0x1d2   : > { %v1503_v21 = vadd.f32 %v1486_v48, %v1470_v18  ;;  %v1502_v22 = vadd.f32 %v1486_v48, %v1395_v20  ;;  %v1472_v23 = vpop.f32.mrb[9].mxu1 }
 0x1d3   : > { %1525 = vst [vmem:[%s2777_s11 + $0x40] sm:$0xff] %v1501_v17  ;;  %v1504_v24 = vadd.f32 %v1486_v48, %v1472_v23  ;;  %1548 = sbr.rel (!%p2916_p11) target bundleno = 503 (0x1f7), region = 56 }
 0x1d4   : > { %1527 = vst [vmem:[%s2777_s11 + $0x50] sm:$0xff] %v1503_v21  ;;  %1526 = vst [vmem:[%s2777_s11 + $0x48] sm:$0xff] %v1502_v22  ;;  %v1399_v25 = vpop.f32.mrb[10].mxu0 }
 0x1d5   : > { %1528 = vst [vmem:[%s2777_s11 + $0x58] sm:$0xff] %v1504_v24  ;;  %v1513_v26 = vadd.f32 %v2775_v19, %v1399_v25  ;;  %v1476_v27 = vpop.f32.mrb[10].mxu1  ;;  %v1401_v28 = vpop.f32.mrb[11].mxu0 }
 0x1d6   : > { %v1515_v29 = vadd.f32 %v2775_v19, %v1476_v27  ;;  %v1514_v30 = vadd.f32 %v2775_v19, %v1401_v28  ;;  %v1478_v31 = vpop.f32.mrb[11].mxu1 }
 0x1d7   : > { %1537 = vst [vmem:[%s2777_s11 + $0xa0] sm:$0xff] %v1513_v26  ;;  %v1516_v32 = vadd.f32 %v2775_v19, %v1478_v31 }
 0x1d8   : > { %1539 = vst [vmem:[%s2777_s11 + $0xb0] sm:$0xff] %v1515_v29  ;;  %1538 = vst [vmem:[%s2777_s11 + $0xa8] sm:$0xff] %v1514_v30 }
 0x1d9   : > { %1540 = vst [vmem:[%s2777_s11 + $0xb8] sm:$0xff] %v1516_v32 }
 0x1da   : > { %s2932_s28 = smov (!%p1551_p2, %s1550_s28), 12 }
 0x1db   : > { %s2822_s12 = sshll.u32 %s2932_s28, 8 }
 0x1dc   : > { %s1555_s17 = ssub.s32 3072, %s2822_s12 }
 0x1dd   : > { %1556 = vsyncadd %s1542_s3, %s1555_s17  ;;  %p1730_p6 = scmp.ne.s32.totalorder %s2822_s12, 0  ;;  %s1743_s6 = smul.u32 1536, %s2210_s21 }
 0x1de   : > { %s1732_s9 = sshll.u32 %s2932_s28, 3  ;;  %s1564_s7 = sshll.u32 %s2777_s11, 4  ;;  %s2836_s7 = int_to_ptr.vmem [resolvable:$true] %s1564_s7 }
 0x1df   : > { %s2834_s27 = scalar_lea.hbm %s2894_s5, %s1743_s6  ;;  %s2128_s29 = scalar_lea.vmem %s2836_s7, %s2822_s12 }
 0x1e0   : > { %p2129_p0 = scmp.ne.s32.totalorder %s2836_s7, %s2128_s29  ;;  %s2231_s16 = smov [#allocation8]  }
 0x1e1   : > { %s2132_s25 = sshll.u32 %s2231_s16, 4  ;;  %s2133_s25 = int_to_ptr.vmem [resolvable:$false] %s2132_s25 }
 0x1e2   : > { %p2130_p7 = pnand %p2129_p0, %p1730_p6  ;;  %s2134_s21 = scalar_lea.vmem %s2133_s25, 6144 }
 0x1e3   : > { %p2135_p12 = scmp.lt.s32.totalorder %s2836_s7, %s2133_s25  ;;  %p2136_p1 = scmp.lt.s32.totalorder %s2134_s21, %s2128_s29 }
 0x1e4   : > { %p2131_p10 = pneg %p2130_p7 }
 0x1e5   : > { %p2137_p5 = por %p2136_p1, %p2135_p12 }
 0x1e7   : > { %p2138_p13 = pnand %p2137_p5, %p2131_p10 }
 0x1e9   : > { %2141 = shalt.err (!%p2138_p13)
}
 0x1ea   : > { %s2142_s14 = scalar_lea.hbm %s2834_s27, %s2822_s12  ;;  %s2146_s11 = scalar_lea.hbm %s2894_s5, 5888 }
 0x1eb   : > { %p2143_p4 = scmp.ne.s32.totalorder %s2834_s27, %s2142_s14  ;;  %p2147_p11 = scmp.lt.u32.totalorder %s2834_s27, %s2894_s5 }
 0x1ec   : > { %p2148_p2 = scmp.lt.u32.totalorder %s2146_s11, %s2142_s14  ;;  %p2150_p7 = scmp.lt.u32.totalorder %s2142_s14, %s2834_s27 }
 0x1ed   : > { %p2144_p8 = pnand %p2143_p4, %p1730_p6 }
 0x1ee   : > { %p2149_p0 = por %p2148_p2, %p2147_p11 }
 0x1ef   : > { %p2145_p9 = pneg %p2144_p8 }
 0x1f0   : > { %p2151_p10 = por %p2150_p7, %p2149_p0 }
 0x1f2   : > { %p2152_p12 = pnand %p2151_p10, %p2145_p9 }
 0x1f4   : > { %2155 = shalt.err (!%p2152_p12)
}
 0x1f5   : > { %s2232_s6 = smov 1536   ;;  %s2233_s24 = smov 2944  }
 0x1f6   : > { %1570 = dma.vmem_to_hbm [thread:$0]  (%p1730_p6), %s2836_s7, %s2822_s12, %s2834_s27, %s1542_s3, %s2232_s6, %s2233_s24, %s1732_s9  }
 0x1f7 PF: > { %s1579_s30 = sand.u32 1, %s2198_s18   ;;  %p2917_p1 = scmp.ne.s32.totalorder %s2905_s8, 0 }
 0x1f8   : > { %s1580_s29 = scalar_lea.sflag [#allocation4], %s1579_s30 }
 0x1f9   : > { %p1978_p5 = pnand %p1690_p3, %p2917_p1 }
 0x1fb   : > { %2193 = dma.done.wait (!%p1978_p5), %s1580_s29, 3072  }
 0x1fc   : > { %2195 = vsyncadd (!%p1978_p5), %s1580_s29, 4294964224  ;;  %s24_s23 = sadd.s32 1, %s2218_s23   ;;  %s2918_s28 = sld [smem:[#allocation14_spill]] }
 0x1fd   : > { %p21_p13 = scmp.ge.s32.totalorder %s24_s23, 4   ;;  %s2919_s13 = sld [smem:[#allocation13_spill]] }
 0x1fe   : > { %s2920_s18 = smov %s2202_s19  ;;  %s2921_s19 = smov %s2206_s20 }
 0x1ff   : > { %s2923_s21 = smov %s2214_s22  ;;  %23 = sbr.rel (!%p21_p13) target bundleno = 10 (0xa), region = 102 }
 0x202   : > { %s2922_s20 = smov %s2918_s28 }
 0x203   : > { %s2924_s22 = smov %s2919_s13 }
 0x206   :  { %1585 = vsyncpa [#allocation3], 1 }
 0x207   :  { %1587 = vsyncpa [#allocation3 + $0x1], 1 }
 0x208   :  { %1588 = vsyncpa [#allocation6], 1 }
 0x209   :  { %1590 = vsyncpa [#allocation6 + $0x1], 1 }
 0x20a   :  { %1591 = vsyncpa [#allocation4], 1 }
 0x20b   :  { %1593 = vsyncpa [#allocation4 + $0x1], 1 }

</bundles_post_ra>
